<compile_context>
chip_gen: v5e
topology: v5e:2x2
jax: 0.10.0
libtpu: 0.0.40
codegen_flags: <defaults>
</compile_context>

<pallas_src>
import functools

import jax
import jax.numpy as jnp
from jax.experimental import pallas as pl
from jax.experimental.pallas import tpu as pltpu

_FEAT_CHUNK = 512            # lanes per feature-reduction chunk
_VMEM_HEADROOM = 16 << 20    # bytes left for compiler internal scratch


def _stable_softplus(x):
    """log(1 + exp(x)) without overflow; exp/log run on the EUP slot."""
    return jnp.maximum(x, 0.0) + jnp.log(1.0 + jnp.exp(-jnp.abs(x)))


def _vmem_capacity_bytes():
    """Physical VMEM per TensorCore, with a conservative (v7x) fallback."""
    try:
        cap = getattr(pltpu.get_tpu_info(), "vmem_capacity_bytes", None)
        if cap:
            return int(cap)
    except Exception:
        pass
    return 64 << 20


def _binomial_loss_kernel(x1_ref, x2_ref, tgt_ref, out_ref, *,
                          alpha, beta, eps, n_rows, tile_n, d, feat_chunk):
    """One batch tile: fused cosine similarity + binomial transform + partials.

    x1_ref, x2_ref : (TILE_N, D)  embeddings
    tgt_ref        : (TILE_N, 1)  int32 labels (1 => positive pair)
    out_ref        : (1, 1, 2)    [pos_loss_sum, neg_loss_sum] for this tile
    """
    # Feature-axis chunked reduction: bounds live f32 temporaries to one chunk
    # (inputs are cast per chunk, not per full tile).
    w12 = jnp.zeros((tile_n, 1), jnp.float32)
    w11 = jnp.zeros((tile_n, 1), jnp.float32)
    w22 = jnp.zeros((tile_n, 1), jnp.float32)
    for start in range(0, d, feat_chunk):
        stop = min(start + feat_chunk, d)
        a = x1_ref[:, start:stop].astype(jnp.float32)
        b = x2_ref[:, start:stop].astype(jnp.float32)
        w12 = w12 + jnp.sum(a * b, axis=1, keepdims=True)
        w11 = w11 + jnp.sum(a * a, axis=1, keepdims=True)
        w22 = w22 + jnp.sum(b * b, axis=1, keepdims=True)

    # cosine_similarity with per-norm eps clamp (matches torch.nn.CosineSimilarity):
    #   cos = <a,b> / (max(||a||, eps) * max(||b||, eps))
    # using max(sqrt(w), eps) == sqrt(max(w, eps^2)); rsqrt goes to the EUP.
    cos = (w12
           * jax.lax.rsqrt(jnp.maximum(w11, eps * eps))
           * jax.lax.rsqrt(jnp.maximum(w22, eps * eps)))

    # Rows past the true batch size read undefined data: sanitize *before* the
    # transcendentals so NaN/Inf from garbage rows can never poison the sums.
    row = (pl.program_id(0) * tile_n
           + jax.lax.broadcasted_iota(jnp.int32, (tile_n, 1), 0))
    valid = row < n_rows
    cos = jnp.where(valid, cos, 0.0)

    # Binomial-deviance terms (fused epilogue; similarity never hits HBM).
    pos_term = (2.0 / beta) * _stable_softplus(-beta * (cos - 0.5))
    neg_term = (2.0 / alpha) * _stable_softplus(alpha * (cos - 2.0))

    is_pos = (tgt_ref[...] == 1) & valid            # (tile_n, 1)
    is_neg = (tgt_ref[...] != 1) & valid            # (tile_n, 1)

    # Pack both partial sums into one (1, 2) store: column 0 = pos, column 1 = neg.
    col = jax.lax.broadcasted_iota(jnp.int32, (tile_n, 2), 1)
    contrib = (jnp.where((col == 0) & is_pos, pos_term, 0.0)
               + jnp.where((col == 1) & is_neg, neg_term, 0.0))   # (tile_n, 2)
    out_ref[0] = jnp.sum(contrib, axis=0, keepdims=True)          # (1, 2)


def binomial_loss(output1, output2, target, *, alpha=50.0, beta=0.5, eps=1e-6):
    """Pallas TPU implementation of BinomialLoss.forward for (N, D) embeddings."""
    assert output1.shape == output2.shape
    assert output1.ndim == 2, "expects (batch, features) embeddings"
    n, d = output1.shape
    target = target.reshape(-1)
    assert target.shape[0] == n

    tgt = target.astype(jnp.int32).reshape(n, 1)
    itemsize = output1.dtype.itemsize
    feat_chunk = min(d, _FEAT_CHUNK)

    # ---- Generation-aware tile sizing (pure byte budget, multiple of 8 rows) ----
    # Per batch-row VMEM cost:
    #   2 input arrays x 2 pipeline buffers x D x itemsize
    # + ~3 chunk-sized f32 temporaries (per-chunk casts + product)
    # + target int32 (double-buffered) + f32 running sums.
    per_row_bytes = (2 * 2 * d * itemsize
                     + 3 * feat_chunk * 4
                     + 2 * 4
                     + 4 * 4)
    vmem_cap = _vmem_capacity_bytes()
    usable = max(vmem_cap - _VMEM_HEADROOM, 8 << 20)

    n_pad8 = ((n + 7) // 8) * 8
    tile_n = max(8, (usable // per_row_bytes) // 8 * 8)
    tile_n = min(tile_n, n_pad8)
    # Keep >=2 grid steps when there's enough work so v7x's second TensorCore
    # gets a share ("parallel" grid axis); a single-tile grid would serialize.
    if tile_n >= n_pad8 and n_pad8 >= 16:
        tile_n = max(8, (pl.cdiv(n_pad8, 2) + 7) // 8 * 8)
    grid = (pl.cdiv(n, tile_n),)

    # Scoped-VMEM limit: cover the real footprint (important on v5e/v6e whose
    # default scoped limits are 16/32 MiB), never exceeding physical capacity.
    footprint = tile_n * per_row_bytes
    vmem_limit = int(min(vmem_cap - (8 << 20),
                         max(footprint + (8 << 20), 32 << 20)))

    kernel = functools.partial(
        _binomial_loss_kernel,
        alpha=float(alpha), beta=float(beta), eps=float(eps),
        n_rows=n, tile_n=tile_n, d=d, feat_chunk=feat_chunk)

    cost = pl.CostEstimate(
        flops=6 * n * d + 12 * n,
        transcendentals=6 * n,                       # 2 exp + 2 log + 2 rsqrt per row
        bytes_accessed=2 * n * d * itemsize + n * 4 + grid[0] * 2 * 4,
    )

    partials = pl.pallas_call(
        kernel,
        out_shape=jax.ShapeDtypeStruct((grid[0], 1, 2), jnp.float32),
        grid=grid,
        in_specs=[
            pl.BlockSpec((tile_n, d), lambda i: (i, 0)),
            pl.BlockSpec((tile_n, d), lambda i: (i, 0)),
            pl.BlockSpec((tile_n, 1), lambda i: (i, 0)),
        ],
        out_specs=pl.BlockSpec((1, 1, 2), lambda i: (i, 0, 0)),
        compiler_params=pltpu.CompilerParams(
            dimension_semantics=("parallel",),
            vmem_limit_bytes=vmem_limit,
        ),
        cost_estimate=cost,
    )(output1, output2, tgt)

    pos_sum = jnp.sum(partials[:, 0, 0])
    neg_sum = jnp.sum(partials[:, 0, 1])
    # Counts don't depend on anything the kernel computes -> wrapper-side.
    n_pos = jnp.sum(target == 1).astype(jnp.float32)
    n_neg = jnp.float32(n) - n_pos
    # Guarded per-class means (the literal reference divides by zero if a class
    # is absent; intended semantics is the per-class mean when present).
    pos_loss = jnp.where(n_pos > 0, pos_sum / jnp.maximum(n_pos, 1.0), 0.0)
    neg_loss = jnp.where(n_neg > 0, neg_sum / jnp.maximum(n_neg, 1.0), 0.0)
    return pos_loss + neg_loss


def _reference(x1, x2, target, alpha=50.0, beta=0.5, eps=1e-6):
    a = x1.astype(jnp.float32)
    b = x2.astype(jnp.float32)
    w12 = jnp.sum(a * b, axis=1)
    n1 = jnp.maximum(jnp.sqrt(jnp.sum(a * a, axis=1)), eps)
    n2 = jnp.maximum(jnp.sqrt(jnp.sum(b * b, axis=1)), eps)
    cos = w12 / (n1 * n2)
    pos_term = (2.0 / beta) * _stable_softplus(-beta * (cos - 0.5))
    neg_term = (2.0 / alpha) * _stable_softplus(alpha * (cos - 2.0))
    is_pos = target == 1
    n_pos = jnp.sum(is_pos)
    n_neg = jnp.sum(~is_pos)
    pos_loss = jnp.where(
        n_pos > 0,
        jnp.sum(jnp.where(is_pos, pos_term, 0.0)) / jnp.maximum(n_pos, 1),
        0.0)
    neg_loss = jnp.where(
        n_neg > 0,
        jnp.sum(jnp.where(~is_pos, neg_term, 0.0)) / jnp.maximum(n_neg, 1),
        0.0)
    return pos_loss + neg_loss


if __name__ == "__main__":
    key = jax.random.PRNGKey(0)
    k1, k2 = jax.random.split(key)
    N, D = 8, 32  # (batch, features) — the module's forward implies 2-D embeddings
    out1 = jax.random.normal(k1, (N, D), dtype=jnp.float32)
    out2 = jax.random.normal(k2, (N, D), dtype=jnp.float32)
    target = jnp.array([1, 0, 1, 0, 1, 1, 0, 0], dtype=jnp.int32)

    loss = binomial_loss(out1, out2, target, alpha=50.0, beta=0.5, eps=1e-6)
    loss = jax.block_until_ready(loss)

    ref = _reference(out1, out2, target, alpha=50.0, beta=0.5, eps=1e-6)
    assert loss.shape == (), loss.shape
    assert jnp.allclose(loss, ref, atol=1e-3, rtol=1e-3), (loss, ref)
    print("KERNEL_OK")
</pallas_src>

<mosaic_0001>
module attributes {stable_mosaic.version = 11 : i64} {
  func.func @_binomial_loss_kernel(%arg0: i32, %arg1: memref<8x32xf32, #tpu.memory_space<vmem>>, %arg2: memref<8x32xf32, #tpu.memory_space<vmem>>, %arg3: memref<8x1xi32, #tpu.memory_space<vmem>>, %arg4: memref<1x1x2xf32, #tpu.memory_space<vmem>>) attributes {dimension_semantics = [#tpu.dimension_semantics<parallel>], iteration_bounds = array<i64: 1>, scalar_prefetch = 0 : i64, scratch_operands = 0 : i64, tpu.core_type = #tpu.core_type<tc>, window_params = [{transform_indices = @transform_0, window_bounds = array<i64: 8, 32>}, {transform_indices = @transform_1, window_bounds = array<i64: 8, 32>}, {transform_indices = @transform_2, window_bounds = array<i64: 8, 1>}, {transform_indices = @transform_3, window_bounds = array<i64: 1, 1, 2>}]} {
    %cst = arith.constant 0.000000e+00 : f32
    %0 = vector.broadcast %cst : f32 to vector<8x1xf32>
    %cst_0 = arith.constant 0.000000e+00 : f32
    %1 = vector.broadcast %cst_0 : f32 to vector<8x1xf32>
    %cst_1 = arith.constant 0.000000e+00 : f32
    %2 = vector.broadcast %cst_1 : f32 to vector<8x1xf32>
    %c0 = arith.constant 0 : index
    %c0_2 = arith.constant 0 : index
    %3 = vector.load %arg1[%c0, %c0_2] : memref<8x32xf32, #tpu.memory_space<vmem>>, vector<8x32xf32>
    %c0_3 = arith.constant 0 : index
    %c0_4 = arith.constant 0 : index
    %4 = vector.load %arg2[%c0_3, %c0_4] : memref<8x32xf32, #tpu.memory_space<vmem>>, vector<8x32xf32>
    %5 = arith.mulf %3, %4 : vector<8x32xf32>
    %cst_5 = arith.constant dense<0.000000e+00> : vector<8xf32>
    %6 = vector.multi_reduction <add>, %5, %cst_5 [1] : vector<8x32xf32> to vector<8xf32>
    %7 = vector.shape_cast %6 : vector<8xf32> to vector<8x1xf32>
    %8 = arith.addf %0, %7 : vector<8x1xf32>
    %9 = arith.mulf %3, %3 : vector<8x32xf32>
    %cst_6 = arith.constant dense<0.000000e+00> : vector<8xf32>
    %10 = vector.multi_reduction <add>, %9, %cst_6 [1] : vector<8x32xf32> to vector<8xf32>
    %11 = vector.shape_cast %10 : vector<8xf32> to vector<8x1xf32>
    %12 = arith.addf %1, %11 : vector<8x1xf32>
    %13 = arith.mulf %4, %4 : vector<8x32xf32>
    %cst_7 = arith.constant dense<0.000000e+00> : vector<8xf32>
    %14 = vector.multi_reduction <add>, %13, %cst_7 [1] : vector<8x32xf32> to vector<8xf32>
    %15 = vector.shape_cast %14 : vector<8xf32> to vector<8x1xf32>
    %16 = arith.addf %2, %15 : vector<8x1xf32>
    %cst_8 = arith.constant 9.99999996E-13 : f32
    %17 = vector.broadcast %cst_8 : f32 to vector<8x1xf32>
    %18 = arith.maximumf %12, %17 : vector<8x1xf32>
    %19 = math.rsqrt %18 : vector<8x1xf32>
    %20 = arith.mulf %8, %19 : vector<8x1xf32>
    %cst_9 = arith.constant 9.99999996E-13 : f32
    %21 = vector.broadcast %cst_9 : f32 to vector<8x1xf32>
    %22 = arith.maximumf %16, %21 : vector<8x1xf32>
    %23 = math.rsqrt %22 : vector<8x1xf32>
    %24 = arith.mulf %20, %23 : vector<8x1xf32>
    %c8_i32 = arith.constant 8 : i32
    %25 = arith.muli %arg0, %c8_i32 : i32
    %26 = tpu.iota {dimensions = array<i32: 0>} : vector<8x1xi32>
    %27 = vector.broadcast %25 : i32 to vector<8x1xi32>
    %28 = arith.addi %27, %26 : vector<8x1xi32>
    %c8_i32_10 = arith.constant 8 : i32
    %29 = vector.broadcast %c8_i32_10 : i32 to vector<8x1xi32>
    %30 = arith.cmpi slt, %28, %29 : vector<8x1xi32>
    %cst_11 = arith.constant 0.000000e+00 : f32
    %31 = vector.broadcast %cst_11 : f32 to vector<8x1xf32>
    %32 = arith.select %30, %24, %31 : vector<8x1xi1>, vector<8x1xf32>
    %cst_12 = arith.constant 5.000000e-01 : f32
    %33 = vector.broadcast %cst_12 : f32 to vector<8x1xf32>
    %34 = arith.subf %32, %33 : vector<8x1xf32>
    %cst_13 = arith.constant -5.000000e-01 : f32
    %35 = vector.broadcast %cst_13 : f32 to vector<8x1xf32>
    %36 = arith.mulf %35, %34 : vector<8x1xf32>
    %cst_14 = arith.constant 0.000000e+00 : f32
    %37 = vector.broadcast %cst_14 : f32 to vector<8x1xf32>
    %38 = arith.maximumf %36, %37 : vector<8x1xf32>
    %39 = math.absf %36 : vector<8x1xf32>
    %cst_15 = arith.constant 0.000000e+00 : f32
    %40 = vector.broadcast %cst_15 : f32 to vector<8x1xf32>
    %41 = arith.subf %40, %39 : vector<8x1xf32>
    %42 = math.exp %41 : vector<8x1xf32>
    %cst_16 = arith.constant 1.000000e+00 : f32
    %43 = vector.broadcast %cst_16 : f32 to vector<8x1xf32>
    %44 = arith.addf %43, %42 : vector<8x1xf32>
    %45 = math.log %44 : vector<8x1xf32>
    %46 = arith.addf %38, %45 : vector<8x1xf32>
    %cst_17 = arith.constant 4.000000e+00 : f32
    %47 = vector.broadcast %cst_17 : f32 to vector<8x1xf32>
    %48 = arith.mulf %47, %46 : vector<8x1xf32>
    %cst_18 = arith.constant 2.000000e+00 : f32
    %49 = vector.broadcast %cst_18 : f32 to vector<8x1xf32>
    %50 = arith.subf %32, %49 : vector<8x1xf32>
    %cst_19 = arith.constant 5.000000e+01 : f32
    %51 = vector.broadcast %cst_19 : f32 to vector<8x1xf32>
    %52 = arith.mulf %51, %50 : vector<8x1xf32>
    %cst_20 = arith.constant 0.000000e+00 : f32
    %53 = vector.broadcast %cst_20 : f32 to vector<8x1xf32>
    %54 = arith.maximumf %52, %53 : vector<8x1xf32>
    %55 = math.absf %52 : vector<8x1xf32>
    %cst_21 = arith.constant 0.000000e+00 : f32
    %56 = vector.broadcast %cst_21 : f32 to vector<8x1xf32>
    %57 = arith.subf %56, %55 : vector<8x1xf32>
    %58 = math.exp %57 : vector<8x1xf32>
    %cst_22 = arith.constant 1.000000e+00 : f32
    %59 = vector.broadcast %cst_22 : f32 to vector<8x1xf32>
    %60 = arith.addf %59, %58 : vector<8x1xf32>
    %61 = math.log %60 : vector<8x1xf32>
    %62 = arith.addf %54, %61 : vector<8x1xf32>
    %cst_23 = arith.constant 4.000000e-02 : f32
    %63 = vector.broadcast %cst_23 : f32 to vector<8x1xf32>
    %64 = arith.mulf %63, %62 : vector<8x1xf32>
    %c0_24 = arith.constant 0 : index
    %c0_25 = arith.constant 0 : index
    %65 = vector.load %arg3[%c0_24, %c0_25] : memref<8x1xi32, #tpu.memory_space<vmem>>, vector<8x1xi32>
    %c1_i32 = arith.constant 1 : i32
    %66 = vector.broadcast %c1_i32 : i32 to vector<8x1xi32>
    %67 = arith.cmpi eq, %65, %66 : vector<8x1xi32>
    %68 = arith.andi %67, %30 : vector<8x1xi1>
    %c0_26 = arith.constant 0 : index
    %c0_27 = arith.constant 0 : index
    %69 = vector.load %arg3[%c0_26, %c0_27] : memref<8x1xi32, #tpu.memory_space<vmem>>, vector<8x1xi32>
    %c1_i32_28 = arith.constant 1 : i32
    %70 = vector.broadcast %c1_i32_28 : i32 to vector<8x1xi32>
    %71 = arith.cmpi ne, %69, %70 : vector<8x1xi32>
    %72 = arith.andi %71, %30 : vector<8x1xi1>
    %73 = tpu.iota {dimensions = array<i32: 1>} : vector<8x2xi32>
    %c0_i32 = arith.constant 0 : i32
    %74 = vector.broadcast %c0_i32 : i32 to vector<8x2xi32>
    %75 = arith.cmpi eq, %73, %74 : vector<8x2xi32>
    %76 = vector.broadcast %68 : vector<8x1xi1> to vector<8x2xi1>
    %77 = arith.andi %75, %76 : vector<8x2xi1>
    %cst_29 = arith.constant 0.000000e+00 : f32
    %78 = vector.shape_cast %48 : vector<8x1xf32> to vector<8x1xf32>
    %79 = vector.broadcast %78 : vector<8x1xf32> to vector<8x2xf32>
    %80 = vector.broadcast %cst_29 : f32 to vector<8x2xf32>
    %81 = arith.select %77, %79, %80 : vector<8x2xi1>, vector<8x2xf32>
    %c1_i32_30 = arith.constant 1 : i32
    %82 = vector.broadcast %c1_i32_30 : i32 to vector<8x2xi32>
    %83 = arith.cmpi eq, %73, %82 : vector<8x2xi32>
    %84 = vector.broadcast %72 : vector<8x1xi1> to vector<8x2xi1>
    %85 = arith.andi %83, %84 : vector<8x2xi1>
    %cst_31 = arith.constant 0.000000e+00 : f32
    %86 = vector.shape_cast %64 : vector<8x1xf32> to vector<8x1xf32>
    %87 = vector.broadcast %86 : vector<8x1xf32> to vector<8x2xf32>
    %88 = vector.broadcast %cst_31 : f32 to vector<8x2xf32>
    %89 = arith.select %85, %87, %88 : vector<8x2xi1>, vector<8x2xf32>
    %90 = arith.addf %81, %89 : vector<8x2xf32>
    %cst_32 = arith.constant dense<0.000000e+00> : vector<2xf32>
    %91 = vector.multi_reduction <add>, %90, %cst_32 [0] : vector<8x2xf32> to vector<2xf32>
    %92 = vector.shape_cast %91 : vector<2xf32> to vector<1x2xf32>
    %c0_33 = arith.constant 0 : index
    %c0_34 = arith.constant 0 : index
    %c0_35 = arith.constant 0 : index
    %93 = vector.load %arg4[%c0_33, %c0_34, %c0_35] : memref<1x1x2xf32, #tpu.memory_space<vmem>>, vector<1x1x2xf32>
    %94 = vector.shape_cast %93 : vector<1x1x2xf32> to vector<1x2xf32>
    %95 = vector.shape_cast %92 : vector<1x2xf32> to vector<1x1x2xf32>
    tpu.vector_store %arg4[%c0_33, %c0_34, %c0_35], %95 {strides = array<i32>} : memref<1x1x2xf32, #tpu.memory_space<vmem>>, vector<1x1x2xf32>,
    return
  }
  func.func @transform_0(%arg0: i32) -> (i32, i32) {
    %c0_i32 = arith.constant 0 : i32
    %c0_i32_0 = arith.constant 0 : i32
    return %arg0, %c0_i32 : i32, i32
  }
  func.func @transform_1(%arg0: i32) -> (i32, i32) {
    %c0_i32 = arith.constant 0 : i32
    %c0_i32_0 = arith.constant 0 : i32
    return %arg0, %c0_i32 : i32, i32
  }
  func.func @transform_2(%arg0: i32) -> (i32, i32) {
    %c0_i32 = arith.constant 0 : i32
    %c0_i32_0 = arith.constant 0 : i32
    return %arg0, %c0_i32 : i32, i32
  }
  func.func @transform_3(%arg0: i32) -> (i32, i32, i32) {
    %c0_i32 = arith.constant 0 : i32
    %c0_i32_0 = arith.constant 0 : i32
    %c0_i32_1 = arith.constant 0 : i32
    return %arg0, %c0_i32, %c0_i32_0 : i32, i32, i32
  }
}

</mosaic_0001>

<bundles_post_ra>
// kernel: tpu_custom_call.1
= control target key start
LH: loop header
LB: loop body
LE: loop exit
PB: predicated region body
PF: predicated region fallthrough
CT: control target
= control target key end

     0   :  { %8 = vsyncpa [#allocation3], 0  ;;  %s260_s0 = inlined_call_operand.vmem [shape: f32[8,32], index: 0, kind: input, shape index: {}]   ;;  %s261_s1 = inlined_call_operand.hbm [shape: f32[8,32], index: 1, kind: input, shape index: {}]   ;;  %s262_s2 = inlined_call_operand.vmem [shape: s32[8,1], index: 2, kind: input, shape index: {}]   ;;  %s263_s3 = inlined_call_operand.hbm [shape: f32[1,1,2], index: 3, kind: output, shape index: {}]  }
   0x1   :  { %9 = vsyncpa [#allocation4], 0  ;;  %s17_s14 = sshll.u32 %s261_s1, 4  ;;  %s225_s15 = smov [#allocation2]   ;;  %s18_s14 = int_to_ptr.hbm [resolvable:$true] %s17_s14 }
   0x2   :  { %s19_s16 = sshll.u32 %s225_s15, 4  ;;  %s20_s16 = int_to_ptr.vmem [resolvable:$true] %s19_s16 }
   0x3   :  { %22 = dma.hbm_to_vmem [thread:$0]  %s18_s14, 128, %s20_s16, [#allocation3]  }
   0x4   :  { %221 = dma.done.wait [#allocation3], 128  }
   0x5   :  { %222 = vsyncadd [#allocation3], 4294967168  ;;  %v226_v0 = vmov 0   ;;  %v29_v1 = vld [vmem:[%s260_s0] sm:$0xff]  ;;  %vm32_vm0 = vcmask 261120   ;;  %v107_v46 = vlaneseq  ;;  %vm126_vm15 = vcmask 15360  }
   0x6   :  { %158 = vset.pattern.permute.xlu1 %v226_v0  ;;  %159 = vset.pattern.permute.xlu2 %v226_v0  ;;  %v30_v2 = vld [vmem:[#allocation2] sm:$0xff]  ;;  %v37_v3 = vmul.f32 %v29_v1, %v29_v1  ;;  %s227_s0 = smov [#allocation5]   ;;  %s143_s22 = sshll.u32 %s263_s3, 4  ;;  %s144_s22 = int_to_ptr.hbm [resolvable:$true] %s143_s22 }
   0x7   :  { %160 = vset.pattern.permute.xlu0 %v226_v0  ;;  %v31_v4 = vmul.f32 %v30_v2, %v29_v1  ;;  %v102_v5 = vld [vmem:[%s262_s2] sm:$0xff]  ;;  %v42_v9 = vmul.f32 %v30_v2, %v30_v2  ;;  %v108_v48 = vand.u32 127, %v107_v46  ;;  %s141_s2 = sshll.u32 %s227_s0, 4  ;;  %s142_s2 = int_to_ptr.vmem [resolvable:$true] %s141_s2 }
   0x8   :  { %vm105_vm1 = vcmp.ne.s32.totalorder %v102_v5, 1  ;;  %v38_v6 = vsel %vm32_vm0, %v37_v3, 0.0  ;;  %vm103_vm2 = vcmp.eq.s32.totalorder %v102_v5, 1 }
   0x9   :  { %v33_v7 = vsel %vm32_vm0, %v31_v4, 0.0  ;;  %v118_v8 = vsel %vm105_vm1, 1, %v226_v0  ;;  %39 = vadd.xlane.f32.xlu0 %v38_v6  ;;  %v43_v10 = vsel %vm32_vm0, %v42_v9, 0.0  ;;  %v110_v11 = vsel %vm103_vm2, 1, %v226_v0 }
   0xa   :  { %34 = vadd.xlane.f32.xlu1 %v33_v7  ;;  %120 = vperm.xlu2 %159, %v118_v8   ;;  %vm109_vm9 = vcmp.eq.s32.totalorder %v108_v48, 0  ;;  %vm117_vm11 = vcmp.eq.s32.totalorder %v108_v48, 1  ;;  %vm134_vm0 = vcmask 8192  }
  0x11   :  { %44 = vadd.xlane.f32.xlu0 %v43_v10 }
  0x23   :  { %112 = vperm.xlu1 %158, %v110_v11  }
  0x64   :  { %v121_v50 = vpop.permute.xlu2 %120 }
  0x65   :  { %vm122_vm12 = vcmp.eq.s32.totalorder %v121_v50, 1 }
  0x66   :  { %vm123_vm14 = vmand %vm117_vm11, %vm122_vm12 }
  0x7c   :  { %v40_v12 = vpop.xlane.xlu0 %39 }
  0x7d   :  { %v47_v13 = vmax.f32 %v40_v12, 1e-12  ;;  %v35_v28 = vpop.xlane.xlu1 %34 }
  0x7f   :  { %161 = vrsqrt.f32 %v47_v13  ;;  %vm54_vm4 = vweird.f32 %v47_v13 }
  0x84   :  { %v45_v14 = vpop.xlane.xlu0 %44 }
  0x85   :  { %v162_v15 = vpop.eup %161  ;;  %v59_v16 = vmax.f32 %v45_v14, 1e-12 }
  0x86   :  { %v49_v17 = vmul.f32 %v162_v15, %v47_v13  ;;  %vm55_vm3 = vweird.f32 %v162_v15 }
  0x87   :  { %163 = vrsqrt.f32 %v59_v16  ;;  %vm56_vm5 = vmor %vm54_vm4, %vm55_vm3  ;;  %vm66_vm7 = vweird.f32 %v59_v16 }
  0x88   :  { %v50_v18 = vmul.f32 %v162_v15, %v49_v17 }
  0x8a   :  { %v51_v19 = vmul.f32 0.5, %v50_v18 }
  0x8c   :  { %v52_v20 = vsub.f32 1.5, %v51_v19 }
  0x8d   :  { %v164_v21 = vpop.eup %163 }
  0x8e   :  { %v61_v22 = vmul.f32 %v164_v21, %v59_v16  ;;  %v53_v24 = vmul.f32 %v162_v15, %v52_v20  ;;  %vm67_vm6 = vweird.f32 %v164_v21 }
  0x8f   :  { %vm68_vm8 = vmor %vm66_vm7, %vm67_vm6 }
  0x90   :  { %v62_v23 = vmul.f32 %v164_v21, %v61_v22  ;;  %v57_v27 = vsel %vm56_vm5, %v162_v15, %v53_v24 }
  0x91   :  { %v58_v30 = vmul.f32 %v57_v27, %v35_v28 }
  0x92   :  { %v63_v25 = vmul.f32 0.5, %v62_v23 }
  0x94   :  { %v64_v26 = vsub.f32 1.5, %v63_v25 }
  0x95   :  { %v113_v49 = vpop.permute.xlu1 %112 }
  0x96   :  { %v65_v29 = vmul.f32 %v164_v21, %v64_v26  ;;  %vm114_vm10 = vcmp.eq.s32.totalorder %v113_v49, 1 }
  0x97   :  { %vm115_vm13 = vmand %vm109_vm9, %vm114_vm10 }
  0x98   :  { %v69_v31 = vsel %vm68_vm8, %v164_v21, %v65_v29 }
  0x99   :  { %v70_v32 = vmul.f32 %v69_v31, %v58_v30 }
  0x9b   :  { %v153_v33 = vadd.f32 -0.5, %v70_v32  ;;  %v154_v34 = vadd.f32 -2.0, %v70_v32 }
  0x9d   :  { %v79_v35 = vmul.f32 -0.5, %v153_v33  ;;  %v91_v36 = vmul.f32 50.0, %v154_v34 }
  0x9f   :  { %v81_v37 = vand.u32 2147483647, %v79_v35  ;;  %v93_v38 = vand.u32 2147483647, %v91_v36  ;;  %v80_v53 = vmax.f32 %v79_v35, 0.0  ;;  %v92_v55 = vmax.f32 %v91_v36, 0.0 }
  0xa1   :  { %v82_v39 = vsub.f32 0.0, %v81_v37  ;;  %v94_v40 = vsub.f32 0.0, %v93_v38 }
  0xa3   :  { %v83_v41 = vmul.f32 1.442695, %v82_v39  ;;  %v95_v42 = vmul.f32 1.442695, %v94_v40 }
  0xa5   :  { %165 = vpow2.f32 %v83_v41 }
  0xa6   :  { %167 = vpow2.f32 %v95_v42 }
  0xab   :  { %v166_v43 = vpop.eup %165 }
  0xac   :  { %v168_v44 = vpop.eup %167  ;;  %v85_v45 = vadd.f32 1.0, %v166_v43 }
  0xad   :  { %v97_v47 = vadd.f32 1.0, %v168_v44 }
  0xae   :  { %169 = vlog2.f32 %v85_v45 }
  0xaf   :  { %171 = vlog2.f32 %v97_v47 }
  0xb4   :  { %v170_v51 = vpop.eup %169 }
  0xb5   :  { %v172_v52 = vpop.eup %171  ;;  %v87_v54 = vmul.f32 0.6931472, %v170_v51 }
  0xb6   :  { %v99_v56 = vmul.f32 0.6931472, %v172_v52 }
  0xb7   :  { %v88_v57 = vadd.f32 %v87_v54, %v80_v53 }
  0xb8   :  { %v100_v58 = vadd.f32 %v99_v56, %v92_v55 }
  0xb9   :  { %v89_v59 = vmul.f32 4.0, %v88_v57 }
  0xba   :  { %v101_v60 = vmul.f32 0.04, %v100_v58 }
  0xbb   :  { %v116_v61 = vsel %vm115_vm13, %v89_v59, 0.0 }
  0xbc   :  { %v124_v62 = vsel %vm123_vm14, %v101_v60, 0.0 }
  0xbd   :  { %v125_v63 = vadd.f32 %v124_v62, %v116_v61 }
  0xbf   :  { %v127_v0 = vsel %vm126_vm15, %v125_v63, 0.0 }
  0xc0   :  { %v128_v1 = vrot.slane %v127_v0, 4 }
  0xc2   :  { %v129_v2 = vadd.f32 %v128_v1, %v127_v0 }
  0xc4   :  { %v130_v3 = vrot.slane %v129_v2, 2 }
  0xc6   :  { %v131_v4 = vadd.f32 %v130_v3, %v129_v2 }
  0xc8   :  { %v132_v5 = vrot.slane %v131_v4, 1 }
  0xca   :  { %v133_v6 = vadd.f32 %v132_v5, %v131_v4 }
  0xcc   :  { %135 = vst.msk [vmem:[#allocation5] sm:$0x1] %vm134_vm0, %v133_v6 }
  0xcd   :  { %146 = dma.vmem_to_hbm [thread:$0]  %s142_s2, 16, %s144_s22, [#allocation4]  }
  0xce   :  { %223 = dma.done.wait [#allocation4], 16  }
  0xcf   :  { %224 = vsyncadd [#allocation4], 4294967280 }
  0xd0   :  { %151 = vsyncpa [#allocation3], 1 }
  0xd1   :  { %152 = vsyncpa [#allocation4], 1 }

</bundles_post_ra>
